<compile_context>
chip_gen: v7x
topology: tpu7x:2x2x1
jax: 0.10.0
libtpu: 0.0.40
codegen_flags: <defaults>
</compile_context>

<pallas_src>
import functools

import jax
import jax.numpy as jnp
import numpy as np
from jax import lax
from jax.experimental import pallas as pl
from jax.experimental.pallas import tpu as pltpu


def _round_up(x, m):
    return (x + m - 1) // m * m


# ---------------------------------------------------------------------------
# Kernels (exactly one pallas_call per Encoder layer)
# ---------------------------------------------------------------------------
def _fused_layer_kernel(a_ref, w_ref, b_ref, y_ref, mom_ref, *, slope, m_valid):
    """conv matmul + folded-BN bias + LeakyReLU + per-tile channel moments.

    a_ref:  (tm, K)  bf16  im2col rows of the (un-normalized) previous activation
    w_ref:  (K, OC)  bf16  conv weights with the previous layer's BN scale folded in
    b_ref:  (1, OC)  f32   per-OC bias from the previous BN fold (zeros for layer 0)
    y_ref:  (tm, OC) bf16  post-LeakyReLU, pre-BN output (this layer's BN folds
                           into the NEXT layer's conv)
    mom_ref:(1, 2, OC) f32 per-tile [sum; sum of squares] over valid rows only
    """
    y = jnp.dot(a_ref[...], w_ref[...], preferred_element_type=jnp.float32)
    y = y + b_ref[...]                                # folded BN bias
    y = jnp.maximum(y, slope * y)                     # LeakyReLU (slope < 1)
    y_ref[...] = y.astype(y_ref.dtype)

    # Zero-padded im2col rows are no longer zero once a folded bias is added,
    # so mask them out of the BatchNorm statistics.
    tm = y.shape[0]
    valid = m_valid - pl.program_id(0) * tm
    row = lax.broadcasted_iota(jnp.int32, y.shape, 0)
    ym = jnp.where(row < valid, y, 0.0)
    mom_ref[0, 0:1, :] = jnp.sum(ym, axis=0, keepdims=True)
    mom_ref[0, 1:2, :] = jnp.sum(ym * ym, axis=0, keepdims=True)


def _last_layer_kernel(a_ref, w_ref, b_ref, o_ref):
    # Final conv (no LeakyReLU / BN): matmul + folded bias from the previous BN.
    o_ref[...] = (jnp.dot(a_ref[...], w_ref[...],
                          preferred_element_type=jnp.float32) + b_ref[...])


# ---------------------------------------------------------------------------
# Helpers
# ---------------------------------------------------------------------------
def _im2col_nhwc(x, kh, kw, stride):
    """x: (N, H, W, C) -> (N*OH*OW, KH*KW*C), OH, OW  (VALID conv)."""
    n, h, w, c = x.shape
    oh = (h - kh) // stride + 1
    ow = (w - kw) // stride + 1
    patches = []
    for i in range(kh):
        for j in range(kw):
            patches.append(
                x[:, i:i + stride * oh:stride, j:j + stride * ow:stride, :])
    p = jnp.stack(patches, axis=3)                    # (N, OH, OW, KH*KW, C)
    return p.reshape(n * oh * ow, kh * kw * c), oh, ow


def _choose_tm(m, k, oc, y_bytes):
    """Pick the M tile: as large as a VMEM budget allows (amortizes ~0.35us
    per grid step) but small enough that there are >= 2 tiles whenever
    possible so both v7x TensorCores get work ("parallel" grid axis)."""
    row_bytes = 2 * (k * 2 + oc * y_bytes)            # double-buffered A + y rows
    budget = 8 << 20
    tm_cap = max(16, min(2048, (budget // max(row_bytes, 1)) // 16 * 16))
    two_tiles = _round_up(max(-(-m // 2), 1), 16)     # ceil(m/2) rounded to 16
    return min(tm_cap, two_tiles)


def _compiler_params(tm, k, oc, y_bytes, extra_out_bytes=0):
    # VMEM limit from the actual tile footprint (double-buffered grid-varying
    # blocks + resident W/bias), generous margin, capped at 32 MiB (v7x-safe).
    need = (2 * (tm * k * 2 + tm * oc * y_bytes + extra_out_bytes)
            + k * oc * 2 + oc * 4)
    limit = int(min(max(2 * need + (4 << 20), 8 << 20), 32 << 20))
    return pltpu.CompilerParams(
        dimension_semantics=("parallel",),            # M tiles are independent
        vmem_limit_bytes=limit)


def _fold_prev_bn(w_mat, pending, kh, kw):
    """Fold the previous layer's BatchNorm (per-input-channel scale/bias) into
    this layer's conv:  A@W with A built from the *un-normalized* activation
    equals (A * scale_k) @ W + bias_k @ W, so scale W per K-row and return the
    per-OC constant bias.  K is laid out as (kh, kw, c) with c fastest."""
    k, oc = w_mat.shape
    if pending is None:
        return w_mat, jnp.zeros((oc,), jnp.float32)
    scale_c, bias_c = pending
    scale_k = jnp.tile(scale_c, kh * kw)              # (K,)
    bias_k = jnp.tile(bias_c, kh * kw)                # (K,)
    b_fold = bias_k @ w_mat                           # (OC,)
    return w_mat * scale_k[:, None], b_fold


# ---------------------------------------------------------------------------
# Layer wrappers
# ---------------------------------------------------------------------------
def conv_fused_layer(x_nhwc, weight, gamma, beta, pending, *, stride,
                     slope=0.1, eps=1e-5):
    """Conv(no bias) + LeakyReLU; returns (y_nhwc bf16, (scale, bias)) where
    (scale, bias) is this layer's training-mode BatchNorm folded for the next
    conv.  `pending` is the fold carried from the previous layer (or None)."""
    oc, c, kh, kw = weight.shape
    n = x_nhwc.shape[0]

    a, oh, ow = _im2col_nhwc(x_nhwc, kh, kw, stride)  # (M, K) bf16
    m, k = a.shape
    w_mat = weight.transpose(2, 3, 1, 0).reshape(k, oc)
    w_mat, b_fold = _fold_prev_bn(w_mat, pending, kh, kw)

    tm = _choose_tm(m, k, oc, 2)
    mp = _round_up(m, tm)
    if mp != m:
        a = jnp.pad(a, ((0, mp - m), (0, 0)))         # zero rows only
    num_tiles = mp // tm

    kern = functools.partial(_fused_layer_kernel, slope=slope, m_valid=m)
    y_p, mom = pl.pallas_call(
        kern,
        out_shape=(jax.ShapeDtypeStruct((mp, oc), jnp.bfloat16),
                   jax.ShapeDtypeStruct((num_tiles, 2, oc), jnp.float32)),
        grid=(num_tiles,),
        in_specs=[
            pl.BlockSpec((tm, k), lambda i: (i, 0)),
            pl.BlockSpec((k, oc), lambda i: (0, 0)),   # VMEM-resident W
            pl.BlockSpec((1, oc), lambda i: (0, 0)),   # VMEM-resident bias
        ],
        out_specs=(pl.BlockSpec((tm, oc), lambda i: (i, 0)),
                   pl.BlockSpec((1, 2, oc), lambda i: (i, 0, 0))),
        compiler_params=_compiler_params(tm, k, oc, 2, 2 * oc * 4),
    )(a.astype(jnp.bfloat16), w_mat.astype(jnp.bfloat16),
      b_fold.reshape(1, oc).astype(jnp.float32))

    # Fold this layer's BatchNorm (biased variance, eps) into per-channel
    # scale/bias that the NEXT layer's conv absorbs.  Tiny; done in JAX.
    tot = jnp.sum(mom, axis=0)                        # (2, OC)
    cnt = jnp.float32(m)
    mean = tot[0] / cnt
    # TODO(synk): E[y^2]-E[y]^2 in f32 can catastrophically cancel for very
    # large-magnitude activations; a centered second pass would require the
    # activation round trip this version deliberately removed.
    var = jnp.maximum(tot[1] / cnt - mean * mean, 0.0)
    scale = gamma * lax.rsqrt(var + eps)
    bias = beta - mean * scale

    return y_p[:m].reshape(n, oh, ow, oc), (scale, bias)


def conv_last_layer(x_nhwc, weight, pending, *, stride):
    """Final Conv(no bias), absorbing the previous layer's BN fold."""
    oc, c, kh, kw = weight.shape
    n = x_nhwc.shape[0]

    a, oh, ow = _im2col_nhwc(x_nhwc, kh, kw, stride)
    m, k = a.shape
    w_mat = weight.transpose(2, 3, 1, 0).reshape(k, oc)
    w_mat, b_fold = _fold_prev_bn(w_mat, pending, kh, kw)

    tm = _choose_tm(m, k, oc, 4)
    mp = _round_up(m, tm)
    if mp != m:
        a = jnp.pad(a, ((0, mp - m), (0, 0)))
    num_tiles = mp // tm

    out_p = pl.pallas_call(
        _last_layer_kernel,
        out_shape=jax.ShapeDtypeStruct((mp, oc), jnp.float32),
        grid=(num_tiles,),
        in_specs=[
            pl.BlockSpec((tm, k), lambda i: (i, 0)),
            pl.BlockSpec((k, oc), lambda i: (0, 0)),
            pl.BlockSpec((1, oc), lambda i: (0, 0)),
        ],
        out_specs=pl.BlockSpec((tm, oc), lambda i: (i, 0)),
        compiler_params=_compiler_params(tm, k, oc, 4, 0),
    )(a.astype(jnp.bfloat16), w_mat.astype(jnp.bfloat16),
      b_fold.reshape(1, oc).astype(jnp.float32))

    return out_p[:m].reshape(n, oh, ow, oc)


# ---------------------------------------------------------------------------
# Module forward + pure-JAX reference
# ---------------------------------------------------------------------------
def encoder_forward(x_nchw, params, KS, ST):
    # Single NCHW<->NHWC transpose at the module boundary; activations stay
    # NHWC/bf16 between layers; layer i's BatchNorm is folded into layer i+1.
    x = jnp.transpose(x_nchw, (0, 2, 3, 1)).astype(jnp.bfloat16)
    pending = None
    nl = len(KS)
    for i in range(nl):
        w = params[f"conv_{i}"]
        if i == nl - 1:
            x = conv_last_layer(x, w, pending, stride=ST[i])
        else:
            x, pending = conv_fused_layer(
                x, w, params[f"bn_gamma_{i}"], params[f"bn_beta_{i}"],
                pending, stride=ST[i])
    return jnp.transpose(x, (0, 3, 1, 2))             # back to NCHW, f32


def encoder_reference(x, params, KS, ST, slope=0.1, eps=1e-5):
    # Pure-JAX f32 reference mirroring the PyTorch module (training-mode BN).
    for i in range(len(KS)):
        w = params[f"conv_{i}"]
        y = lax.conv_general_dilated(x, w, (ST[i], ST[i]), "VALID",
                                     dimension_numbers=("NCHW", "OIHW", "NCHW"))
        if i != len(KS) - 1:
            y = jnp.where(y >= 0.0, y, slope * y)
            mean = jnp.mean(y, axis=(0, 2, 3), keepdims=True)
            var = jnp.mean((y - mean) ** 2, axis=(0, 2, 3), keepdims=True)
            g = params[f"bn_gamma_{i}"].reshape(1, -1, 1, 1)
            b = params[f"bn_beta_{i}"].reshape(1, -1, 1, 1)
            y = (y - mean) * lax.rsqrt(var + eps) * g + b
        x = y
    return x


if __name__ == "__main__":
    # Encoder(KS, ST, DP, LS, nc): LS is unused by the module's forward.
    KS = [3, 3]
    ST = [2, 2]
    DP = [8, 16]
    nc = 4

    key = jax.random.PRNGKey(0)
    kx, *kws = jax.random.split(key, 2 + len(KS))
    x = jax.random.normal(kx, (2, nc, 16, 16), jnp.float32)

    # Deterministic parameter init (Conv2d weights random; BN gamma=1, beta=0
    # matching PyTorch defaults).
    params = {}
    last = nc
    for i in range(len(KS)):
        params[f"conv_{i}"] = 0.1 * jax.random.normal(
            kws[i], (DP[i], last, KS[i], KS[i]), jnp.float32)
        if i != len(KS) - 1:
            params[f"bn_gamma_{i}"] = jnp.ones((DP[i],), jnp.float32)
            params[f"bn_beta_{i}"] = jnp.zeros((DP[i],), jnp.float32)
        last = DP[i]

    fwd = jax.jit(lambda xx, pp: encoder_forward(xx, pp, KS, ST))
    out = jax.block_until_ready(fwd(x, params))
    ref = jax.block_until_ready(encoder_reference(x, params, KS, ST))

    assert out.shape == ref.shape == (2, DP[-1], 3, 3), (out.shape, ref.shape)
    # Tolerance reflects bf16 MXU inputs / bf16 inter-layer activation
    # (f32 accumulation) vs the f32 reference; structural errors would be
    # orders of magnitude larger.
    np.testing.assert_allclose(np.asarray(out), np.asarray(ref),
                               rtol=5e-2, atol=5e-2)
    # TODO(synk): BatchNorm2d running-stats momentum update (training-time
    # in-place side effect) is not reproduced; it does not affect the output.
    print("KERNEL_OK")
</pallas_src>

<mosaic_0001>
module attributes {stable_mosaic.version = 11 : i64} {
  func.func @_fused_layer_kernel(%arg0: i32, %arg1: memref<64x36xbf16, #tpu.memory_space<vmem>>, %arg2: memref<36x8xbf16, #tpu.memory_space<vmem>>, %arg3: memref<1x8xf32, #tpu.memory_space<vmem>>, %arg4: memref<64x8xbf16, #tpu.memory_space<vmem>>, %arg5: memref<1x2x8xf32, #tpu.memory_space<vmem>>) attributes {dimension_semantics = [#tpu.dimension_semantics<parallel>], iteration_bounds = array<i64: 2>, scalar_prefetch = 0 : i64, scratch_operands = 0 : i64, tpu.core_type = #tpu.core_type<tc>, window_params = [{transform_indices = @transform_0, window_bounds = array<i64: 64, 36>}, {pipeline_mode = #tpu.pipeline_mode<synchronous>, transform_indices = @transform_1, window_bounds = array<i64: 36, 8>}, {pipeline_mode = #tpu.pipeline_mode<synchronous>, transform_indices = @transform_2, window_bounds = array<i64: 1, 8>}, {transform_indices = @transform_3, window_bounds = array<i64: 64, 8>}, {transform_indices = @transform_4, window_bounds = array<i64: 1, 2, 8>}]} {
    %c0 = arith.constant 0 : index
    %c0_0 = arith.constant 0 : index
    %0 = vector.load %arg1[%c0, %c0_0] : memref<64x36xbf16, #tpu.memory_space<vmem>>, vector<64x36xbf16>
    %c0_1 = arith.constant 0 : index
    %c0_2 = arith.constant 0 : index
    %1 = vector.load %arg2[%c0_1, %c0_2] : memref<36x8xbf16, #tpu.memory_space<vmem>>, vector<36x8xbf16>
    %cst = arith.constant dense<0.000000e+00> : vector<64x8xf32>
    %2 = tpu.matmul %0, %1, %cst {dimension_numbers = #tpu.dot_dimension_numbers<[1], [0], [0], [1], [0, 0, 1, 1], [], []>} : vector<64x36xbf16>, vector<36x8xbf16>, vector<64x8xf32> -> vector<64x8xf32>
    %c0_3 = arith.constant 0 : index
    %c0_4 = arith.constant 0 : index
    %3 = vector.load %arg3[%c0_3, %c0_4] : memref<1x8xf32, #tpu.memory_space<vmem>>, vector<1x8xf32>
    %4 = vector.broadcast %3 : vector<1x8xf32> to vector<64x8xf32>
    %5 = arith.addf %2, %4 : vector<64x8xf32>
    %cst_5 = arith.constant 1.000000e-01 : f32
    %6 = vector.broadcast %cst_5 : f32 to vector<64x8xf32>
    %7 = arith.mulf %6, %5 : vector<64x8xf32>
    %8 = arith.maximumf %5, %7 : vector<64x8xf32>
    %9 = arith.truncf %8 : vector<64x8xf32> to vector<64x8xbf16>
    %c0_6 = arith.constant 0 : index
    %c0_7 = arith.constant 0 : index
    %10 = vector.load %arg4[%c0_6, %c0_7] : memref<64x8xbf16, #tpu.memory_space<vmem>>, vector<64x8xbf16>
    tpu.vector_store %arg4[%c0_6, %c0_7], %9 {strides = array<i32>} : memref<64x8xbf16, #tpu.memory_space<vmem>>, vector<64x8xbf16>,
    %c64_i32 = arith.constant 64 : i32
    %11 = arith.muli %arg0, %c64_i32 : i32
    %c98_i32 = arith.constant 98 : i32
    %12 = arith.subi %c98_i32, %11 : i32
    %13 = tpu.iota {dimensions = array<i32: 0>} : vector<64x8xi32>
    %14 = vector.broadcast %12 : i32 to vector<64x8xi32>
    %15 = arith.cmpi slt, %13, %14 : vector<64x8xi32>
    %cst_8 = arith.constant 0.000000e+00 : f32
    %16 = vector.broadcast %cst_8 : f32 to vector<64x8xf32>
    %17 = arith.select %15, %8, %16 : vector<64x8xi1>, vector<64x8xf32>
    %cst_9 = arith.constant dense<0.000000e+00> : vector<8xf32>
    %18 = vector.multi_reduction <add>, %17, %cst_9 [0] : vector<64x8xf32> to vector<8xf32>
    %19 = vector.shape_cast %18 : vector<8xf32> to vector<1x8xf32>
    %c0_10 = arith.constant 0 : index
    %c0_11 = arith.constant 0 : index
    %c0_12 = arith.constant 0 : index
    %20 = vector.load %arg5[%c0_10, %c0_11, %c0_12] : memref<1x2x8xf32, #tpu.memory_space<vmem>>, vector<1x1x8xf32>
    %21 = vector.shape_cast %20 : vector<1x1x8xf32> to vector<1x8xf32>
    %22 = vector.shape_cast %19 : vector<1x8xf32> to vector<1x1x8xf32>
    tpu.vector_store %arg5[%c0_10, %c0_11, %c0_12], %22 {strides = array<i32>} : memref<1x2x8xf32, #tpu.memory_space<vmem>>, vector<1x1x8xf32>,
    %23 = arith.mulf %17, %17 : vector<64x8xf32>
    %cst_13 = arith.constant dense<0.000000e+00> : vector<8xf32>
    %24 = vector.multi_reduction <add>, %23, %cst_13 [0] : vector<64x8xf32> to vector<8xf32>
    %25 = vector.shape_cast %24 : vector<8xf32> to vector<1x8xf32>
    %c0_14 = arith.constant 0 : index
    %c1 = arith.constant 1 : index
    %c0_15 = arith.constant 0 : index
    %26 = vector.load %arg5[%c0_14, %c1, %c0_15] : memref<1x2x8xf32, #tpu.memory_space<vmem>>, vector<1x1x8xf32>
    %27 = vector.shape_cast %26 : vector<1x1x8xf32> to vector<1x8xf32>
    %28 = vector.shape_cast %25 : vector<1x8xf32> to vector<1x1x8xf32>
    tpu.vector_store %arg5[%c0_14, %c1, %c0_15], %28 {strides = array<i32>} : memref<1x2x8xf32, #tpu.memory_space<vmem>>, vector<1x1x8xf32>,
    return
  }
  func.func @transform_0(%arg0: i32) -> (i32, i32) {
    %c0_i32 = arith.constant 0 : i32
    %c0_i32_0 = arith.constant 0 : i32
    return %arg0, %c0_i32 : i32, i32
  }
  func.func @transform_1(%arg0: i32) -> (i32, i32) {
    %c0_i32 = arith.constant 0 : i32
    %c0_i32_0 = arith.constant 0 : i32
    %c0_i32_1 = arith.constant 0 : i32
    return %c0_i32, %c0_i32_0 : i32, i32
  }
  func.func @transform_2(%arg0: i32) -> (i32, i32) {
    %c0_i32 = arith.constant 0 : i32
    %c0_i32_0 = arith.constant 0 : i32
    %c0_i32_1 = arith.constant 0 : i32
    return %c0_i32, %c0_i32_0 : i32, i32
  }
  func.func @transform_3(%arg0: i32) -> (i32, i32) {
    %c0_i32 = arith.constant 0 : i32
    %c0_i32_0 = arith.constant 0 : i32
    return %arg0, %c0_i32 : i32, i32
  }
  func.func @transform_4(%arg0: i32) -> (i32, i32, i32) {
    %c0_i32 = arith.constant 0 : i32
    %c0_i32_0 = arith.constant 0 : i32
    %c0_i32_1 = arith.constant 0 : i32
    return %arg0, %c0_i32, %c0_i32_0 : i32, i32, i32
  }
}

module attributes {stable_mosaic.version = 11 : i64} {
  func.func @_last_layer_kernel(%arg0: i32, %arg1: memref<16x72xbf16, #tpu.memory_space<vmem>>, %arg2: memref<72x16xbf16, #tpu.memory_space<vmem>>, %arg3: memref<1x16xf32, #tpu.memory_space<vmem>>, %arg4: memref<16x16xf32, #tpu.memory_space<vmem>>) attributes {dimension_semantics = [#tpu.dimension_semantics<parallel>], iteration_bounds = array<i64: 2>, scalar_prefetch = 0 : i64, scratch_operands = 0 : i64, tpu.core_type = #tpu.core_type<tc>, window_params = [{transform_indices = @transform_0, window_bounds = array<i64: 16, 72>}, {pipeline_mode = #tpu.pipeline_mode<synchronous>, transform_indices = @transform_1, window_bounds = array<i64: 72, 16>}, {pipeline_mode = #tpu.pipeline_mode<synchronous>, transform_indices = @transform_2, window_bounds = array<i64: 1, 16>}, {transform_indices = @transform_3, window_bounds = array<i64: 16, 16>}]} {
    %c0 = arith.constant 0 : index
    %c0_0 = arith.constant 0 : index
    %0 = vector.load %arg1[%c0, %c0_0] : memref<16x72xbf16, #tpu.memory_space<vmem>>, vector<16x72xbf16>
    %c0_1 = arith.constant 0 : index
    %c0_2 = arith.constant 0 : index
    %1 = vector.load %arg2[%c0_1, %c0_2] : memref<72x16xbf16, #tpu.memory_space<vmem>>, vector<72x16xbf16>
    %cst = arith.constant dense<0.000000e+00> : vector<16x16xf32>
    %2 = tpu.matmul %0, %1, %cst {dimension_numbers = #tpu.dot_dimension_numbers<[1], [0], [0], [1], [0, 0, 1, 1], [], []>} : vector<16x72xbf16>, vector<72x16xbf16>, vector<16x16xf32> -> vector<16x16xf32>
    %c0_3 = arith.constant 0 : index
    %c0_4 = arith.constant 0 : index
    %3 = vector.load %arg3[%c0_3, %c0_4] : memref<1x16xf32, #tpu.memory_space<vmem>>, vector<1x16xf32>
    %4 = vector.broadcast %3 : vector<1x16xf32> to vector<16x16xf32>
    %5 = arith.addf %2, %4 : vector<16x16xf32>
    %c0_5 = arith.constant 0 : index
    %c0_6 = arith.constant 0 : index
    %6 = vector.load %arg4[%c0_5, %c0_6] : memref<16x16xf32, #tpu.memory_space<vmem>>, vector<16x16xf32>
    tpu.vector_store %arg4[%c0_5, %c0_6], %5 {strides = array<i32>} : memref<16x16xf32, #tpu.memory_space<vmem>>, vector<16x16xf32>,
    return
  }
  func.func @transform_0(%arg0: i32) -> (i32, i32) {
    %c0_i32 = arith.constant 0 : i32
    %c0_i32_0 = arith.constant 0 : i32
    return %arg0, %c0_i32 : i32, i32
  }
  func.func @transform_1(%arg0: i32) -> (i32, i32) {
    %c0_i32 = arith.constant 0 : i32
    %c0_i32_0 = arith.constant 0 : i32
    %c0_i32_1 = arith.constant 0 : i32
    return %c0_i32, %c0_i32_0 : i32, i32
  }
  func.func @transform_2(%arg0: i32) -> (i32, i32) {
    %c0_i32 = arith.constant 0 : i32
    %c0_i32_0 = arith.constant 0 : i32
    %c0_i32_1 = arith.constant 0 : i32
    return %c0_i32, %c0_i32_0 : i32, i32
  }
  func.func @transform_3(%arg0: i32) -> (i32, i32) {
    %c0_i32 = arith.constant 0 : i32
    %c0_i32_0 = arith.constant 0 : i32
    return %arg0, %c0_i32 : i32, i32
  }
}

</mosaic_0001>

<bundles_post_ra>
// kernel: tile.17
= control target key start
LH: loop header
LB: loop body
LE: loop exit
PB: predicated region body
PF: predicated region fallthrough
CT: control target
= control target key end

     0   :  { %s28_s0 = inlined_call_operand.vmem [shape: f32[8], index: 0, kind: input, shape index: {}]   ;;  %s29_s1 = inlined_call_operand.vmem [shape: f32[9,8], index: 1, kind: output, shape index: {}]  }
   0x1   :  { %v4_v0 = vld [vmem:[%s28_s0] ss:$0 sm:$0xff] }
   0x2   :  { %5 = vst [vmem:[%s29_s1] sm:$0xff] %v4_v0  ;;  %8 = vst [vmem:[%s29_s1 + $0x8] sm:$0xff] %v4_v0 }

// kernel: tile.18
= control target key start
LH: loop header
LB: loop body
LE: loop exit
PB: predicated region body
PF: predicated region fallthrough
CT: control target
= control target key end

     0   :  { %s75_s10 = smov 64   ;;  %s76_s11 = smov 48   ;;  %vm3_vm0 = vcmask 64512   ;;  %vm9_vm1 = vcmask 589312   ;;  %vm15_vm2 = vcmask 523712   ;;  %vm21_vm3 = vcmask 458112   ;;  %s123_s0 = inlined_call_operand.vmem [shape: f32[9,8], index: 0, kind: input, shape index: {}]   ;;  %s124_s1 = inlined_call_operand.vmem [shape: f32[72], index: 1, kind: output, shape index: {}]  }
   0x1   :  { %v59_v0 = vld [vmem:[%s123_s0 + $0x8] sm:$0x1]   ;;  %v61_v1 = vld [vmem:[%s123_s0 + $0x6] sm:$0x1]   ;;  %v60_v2 = vld [vmem:[%s123_s0 + $0x7] sm:$0x1]  }
   0x2   :  { %7 = vrot.lane.b32.xlu0 %v59_v0, %s75_s10  ;;  %19 = vrot.lane.b32.xlu1 %v61_v1, %s76_s11  ;;  %v62_v3 = vld [vmem:[%s123_s0 + $0x5] sm:$0x1]   ;;  %v2_v4 = vld [vmem:[%s123_s0] sm:$0x1]   ;;  %s77_s18 = smov 56   ;;  %s78_s19 = smov 40  }
   0x3   :  { %4 = vst.msk [vmem:[#allocation0] sm:$0x1] %vm3_vm0, %v2_v4   ;;  %v63_v5 = vld [vmem:[%s123_s0 + $0x4] sm:$0x1]   ;;  %v64_v6 = vld [vmem:[%s123_s0 + $0x3] sm:$0x1]  }
   0x4   :  { %s79_s24 = smov 32   ;;  %s80_s25 = smov 24   ;;  %v65_v7 = vld [vmem:[%s123_s0 + $0x2] sm:$0x1]   ;;  %v66_v8 = vld [vmem:[%s123_s0 + $0x1] sm:$0x1]  }
   0x5   :  { %s81_s0 = smov 16   ;;  %s82_s30 = smov 8   ;;  %vm27_vm4 = vcmask 392512   ;;  %vm33_vm5 = vcmask 326912   ;;  %vm39_vm6 = vcmask 261312   ;;  %vm45_vm7 = vcmask 195712  }
   0x6   :  { %13 = vrot.lane.b32.xlu0 %v60_v2, %s77_s18  ;;  %25 = vrot.lane.b32.xlu1 %v62_v3, %s78_s19  ;;  %vm51_vm8 = vcmask 130112  }
   0xa   :  { %31 = vrot.lane.b32.xlu0 %v63_v5, %s79_s24  ;;  %37 = vrot.lane.b32.xlu1 %v64_v6, %s80_s25 }
   0xe   :  { %43 = vrot.lane.b32.xlu0 %v65_v7, %s81_s0  ;;  %49 = vrot.lane.b32.xlu1 %v66_v8, %s82_s30 }
  0x74   :  { %v8_v9 = vpop.permute.xlu0 %7   ;;  %v20_v10 = vpop.permute.xlu1 %19  }
  0x75   :  { %10 = vst.msk [vmem:[#allocation0] sm:$0x1] %vm9_vm1, %v8_v9  }
  0x78   :  { %v14_v11 = vpop.permute.xlu0 %13   ;;  %v26_v12 = vpop.permute.xlu1 %25  }
  0x79   :  { %16 = vst.msk [vmem:[#allocation0] sm:$0x1] %vm15_vm2, %v14_v11  }
  0x7a   :  { %22 = vst.msk [vmem:[#allocation0] sm:$0x1] %vm21_vm3, %v20_v10  }
  0x7b   :  { %28 = vst.msk [vmem:[#allocation0] sm:$0x1] %vm27_vm4, %v26_v12  }
  0x7c   :  { %v32_v13 = vpop.permute.xlu0 %31   ;;  %v38_v14 = vpop.permute.xlu1 %37  }
  0x7d   :  { %34 = vst.msk [vmem:[#allocation0] sm:$0x1] %vm33_vm5, %v32_v13  }
  0x7e   :  { %40 = vst.msk [vmem:[#allocation0] sm:$0x1] %vm39_vm6, %v38_v14  }
  0x80   :  { %v44_v15 = vpop.permute.xlu0 %43   ;;  %v50_v16 = vpop.permute.xlu1 %49  }
  0x81   :  { %46 = vst.msk [vmem:[#allocation0] sm:$0x1] %vm45_vm7, %v44_v15  }
  0x82   :  { %52 = vst.msk [vmem:[#allocation0] sm:$0x1] %vm51_vm8, %v50_v16  }
  0x89   :  { %v56_v17 = vld [vmem:[#allocation0] sm:$0x1] }
  0x8a   :  { %58 = vst [vmem:[%s124_s1] sm:$0x1] %v56_v17 }

// kernel: _lambda_.2
= control target key start
LH: loop header
LB: loop body
LE: loop exit
PB: predicated region body
PF: predicated region fallthrough
CT: control target
= control target key end

     0   :  { %s694_s15 = smov 0   ;;  %s805_s0 = inlined_call_operand.vmem [shape: bf16[128,36], index: 0, kind: input, shape index: {}]   ;;  %s806_s1 = inlined_call_operand.vmem [shape: bf16[36,8], index: 1, kind: input, shape index: {}]   ;;  %s807_s2 = inlined_call_operand.vmem [shape: f32[1,8], index: 2, kind: input, shape index: {}]   ;;  %s808_s3 = inlined_call_operand.vmem [shape: bf16[128,8], index: 3, kind: output, shape index: {0}]   ;;  %s809_s4 = inlined_call_operand.vmem [shape: f32[2,2,8], index: 4, kind: output, shape index: {1}]  }
   0x1 LB: > { %s700_s16 = sadd.s32 4294967295, %s667_s15   ;;  %p580_p0 = scmp.ge.s32.totalorder %s667_s15, 1  ;;  %s667_s15 = sphi %s694_s15, %s15_s15  }
   0x2   : > { %p166_p1 = scmp.lt.s32.totalorder %s667_s15, 3 }
   0x4   : > { %p167_p2 = pnand %p580_p0, %p166_p1 }
   0x5   : > { %v654_v0 = vld [vmem:[%s806_s1] sm:$0xff] (!%p167_p2)   ;;  %v655_v1 = vld [vmem:[%s806_s1 + $0x8] sm:$0xff] (!%p167_p2)   ;;  %s581_s21 = sshll.u32 (!%p167_p2), %s700_s16, 3  ;;  %v656_v2 = vld [vmem:[%s806_s1 + $0x10] ss:$0 sps:$4 sm:$0x33] (!%p167_p2)   ;;  %v409_v8 = vlaneseq (!%p167_p2) }
   0x6   : > { %170 = sbr.rel (%p167_p2) target bundleno = 270 (0x10e), region = 32  ;;  %624 = vmatprep.subr.bf16.mxu0 (!%p167_p2), %v654_v0  ;;  %638 = vmatprep.subr.bf16.mxu1 (!%p167_p2), %v654_v0  ;;  %p197_p3 = scmp.lt.s32.totalorder (!%p167_p2), %s581_s21, 15  ;;  %vm281_vm0 = vcmask (!%p167_p2), 1041408   ;;  %vm268_vm1 = vcmask (!%p167_p2), 293888   ;;  %v586_v12 = vld [vmem:[%s807_s2] ss:$0 sm:$0xff] (!%p167_p2) }
   0x7   : > { %625 = vmatpush3.bf16.msra.mxu0 (!%p167_p2), %v654_v0  ;;  %641 = vmatpush3.bf16.msra.mxu1 (!%p167_p2), %v654_v0  ;;  %v283_v3 = vsel (!%p167_p2), %vm281_vm0, %v656_v2, 0  ;;  %s606_s28 = sshll.u32 (!%p167_p2), %s700_s16, 6  ;;  %v410_v9 = vshrl.u32 (!%p167_p2), %v409_v8, 7  ;;  %vm398_vm3 = vcmask (!%p167_p2), 60416   ;;  %vm435_vm5 = vcmask (!%p167_p2), 64512   ;;  %p208_p4 = scmp.lt.s32.totalorder (!%p167_p2), %s700_s16, 1 }
   0x8   : > { %626 = vmatprep.subr.bf16.mxu0 (!%p167_p2), %v655_v1  ;;  %639 = vmatprep.subr.bf16.mxu1 (!%p167_p2), %v655_v1  ;;  %s408_s29 = ssub.s32 (!%p167_p2), 98, %s606_s28  ;;  %vm457_vm12 = vcmask (!%p167_p2), 57344  }
   0x9   : > { %v412_v10 = vadd.s32 (!%p167_p2), 16, %v410_v9  ;;  %v723_v11 = vstv (!%p167_p2), %s408_s29  ;;  %v413_v17 = vadd.s32 (!%p167_p2), 24, %v410_v9  ;;  %v411_v22 = vadd.s32 (!%p167_p2), 8, %v410_v9 }
   0xa   : > { %v729_v23 = vadd.s32 (!%p167_p2), 48, %v410_v9  ;;  %vm419_vm4 = vcmp.lt.s32.totalorder (!%p167_p2), %v410_v9, %v723_v11  ;;  %v414_v34 = vadd.s32 (!%p167_p2), 32, %v410_v9  ;;  %v732_v38 = vadd.s32 (!%p167_p2), 56, %v410_v9 }
   0xb   : > { %627 = vmatpush3.bf16.msra.mxu0 (!%p167_p2), %v655_v1  ;;  %642 = vmatpush3.bf16.msra.mxu1 (!%p167_p2), %v655_v1  ;;  %vm421_vm2 = vcmp.lt.s32.totalorder (!%p167_p2), %v412_v10, %v723_v11  ;;  %vm422_vm6 = vcmp.lt.s32.totalorder (!%p167_p2), %v413_v17, %v723_v11  ;;  %vm420_vm7 = vcmp.lt.s32.totalorder (!%p167_p2), %v411_v22, %v723_v11  ;;  %v415_v51 = vadd.s32 (!%p167_p2), 40, %v410_v9 }
   0xc   : > { %644 = vmatprep.subr.msk.bf16.mxu0 (!%p167_p2), %vm281_vm0, %v656_v2  ;;  %645 = vmatprep.subr.msk.bf16.mxu1 (!%p167_p2), %vm281_vm0, %v656_v2  ;;  %vm425_vm8 = vcmp.lt.s32.totalorder (!%p167_p2), %v729_v23, %v723_v11  ;;  %vm423_vm9 = vcmp.lt.s32.totalorder (!%p167_p2), %v414_v34, %v723_v11  ;;  %vm426_vm10 = vcmp.lt.s32.totalorder (!%p167_p2), %v732_v38, %v723_v11 }
   0xd   : > { %s811_s21 = smov (!%p197_p3, %s581_s21), 15  ;;  %vm424_vm11 = vcmp.lt.s32.totalorder %v415_v51, %v723_v11  ;;  %s813_s16 = smov (!%p208_p4, %s700_s16), 1 }
   0xe   : > { %s582_s24 = sshll.u32 %s811_s21, 2  ;;  %s585_s9 = sshll.u32 %s813_s16, 1 }
   0xf   : > { %s200_s27 = scalar_lea.vmem %s805_s0, %s582_s24  ;;  %629 = vmatpush3.bf16.msra.mxu0 %v283_v3  ;;  %643 = vmatpush3.bf16.msra.mxu1 %v283_v3  ;;  %s739_s8 = scalar_lea.vmem %s808_s3, %s582_s24 }
  0x10   : > { %v657_v4 = vld [vmem:[%s200_s27] sm:$0xff]   ;;  %v658_v5 = vld [vmem:[%s200_s27 + $0x8] sm:$0xff]   ;;  %v659_v6 = vld [vmem:[%s200_s27 + $0x10] sm:$0xff]   ;;  %s211_s12 = scalar_lea.vmem %s809_s4, %s585_s9 }
  0x11   : > { %630 = vmatprep.mubr.msk.bf16.mxu0 %vm268_vm1, %v657_v4  ;;  %v660_v7 = vld [vmem:[%s200_s27 + $0x18] sm:$0xff]   ;;  %634 = vmatprep.mubr.msk.bf16.mxu1 %vm268_vm1, %v659_v6 }
  0x12   : > { %631 = vmatmul.mubr.msk.bf16.vlgmr.msra.gmra.mrb[0].mxu0 %vm268_vm1, %v658_v5  ;;  %635 = vmatmul.mubr.msk.bf16.vlgmr.msra.gmra.mrb[0].mxu1 %vm268_vm1, %v660_v7 }
  0xe5   : > { %v632_v13 = vpop.f32.mrb[0].mxu0  ;;  %v636_v14 = vpop.f32.mrb[0].mxu1 }
  0xe6   : > { %v328_v15 = vadd.f32 %v632_v13, %v586_v12  ;;  %v319_v16 = vpop.f32.mrb[1].mxu0  ;;  %v344_v18 = vadd.f32 %v636_v14, %v586_v12  ;;  %v335_v19 = vpop.f32.mrb[1].mxu1 }
  0xe7   : > { %v320_v20 = vadd.f32 %v586_v12, %v319_v16  ;;  %v633_v21 = vpop.f32.mrb[2].mxu0  ;;  %v336_v24 = vadd.f32 %v586_v12, %v335_v19  ;;  %v637_v25 = vpop.f32.mrb[2].mxu1 }
  0xe8   : > { %v352_v26 = vmul.f32 0.1, %v328_v15  ;;  %v331_v27 = vadd.f32 %v633_v21, %v586_v12  ;;  %v322_v28 = vpop.f32.mrb[3].mxu0  ;;  %v356_v29 = vmul.f32 0.1, %v344_v18  ;;  %v338_v30 = vpop.f32.mrb[3].mxu1  ;;  %v347_v41 = vadd.f32 %v637_v25, %v586_v12 }
  0xe9   : > { %v350_v31 = vmul.f32 0.1, %v320_v20  ;;  %v323_v32 = vadd.f32 %v586_v12, %v322_v28  ;;  %v354_v33 = vmul.f32 0.1, %v336_v24  ;;  %v339_v42 = vadd.f32 %v586_v12, %v338_v30 }
  0xea   : > { %v360_v35 = vmax.f32 %v328_v15, %v352_v26  ;;  %v353_v36 = vmul.f32 0.1, %v331_v27  ;;  %v364_v37 = vmax.f32 %v344_v18, %v356_v29  ;;  %v357_v53 = vmul.f32 0.1, %v347_v41 }
  0xeb   : > { %v358_v39 = vmax.f32 %v320_v20, %v350_v31  ;;  %v351_v40 = vmul.f32 0.1, %v323_v32  ;;  %v362_v46 = vmax.f32 %v336_v24, %v354_v33  ;;  %v355_v54 = vmul.f32 0.1, %v339_v42 }
  0xec   : > { %v611_v43 = vpack.c.bf16 %v360_v35, %v360_v35  ;;  %v361_v44 = vmax.f32 %v331_v27, %v353_v36  ;;  %v615_v45 = vpack.c.bf16 %v364_v37, %v364_v37  ;;  %v429_v49 = vsel %vm421_vm2, %v360_v35, 0.0 }
  0xed   : > { %v609_v47 = vpack.c.bf16 %v358_v39, %v358_v39  ;;  %v427_v48 = vsel %vm419_vm4, %v358_v39, 0.0  ;;  %v359_v52 = vmax.f32 %v323_v32, %v351_v40  ;;  %v613_v56 = vpack.c.bf16 %v362_v46, %v362_v46 }
  0xee   : > { %401 = vst.msk [vmem:[%s739_s8 + $0x8] sm:$0xf] %vm398_vm3, %v611_v43  ;;  %v612_v50 = vpack.c.bf16 %v361_v44, %v361_v44  ;;  %405 = vst.msk [vmem:[%s739_s8 + $0x18] sm:$0xf] %vm398_vm3, %v615_v45  ;;  %v459_v55 = vmul.f32 %v427_v48, %v427_v48  ;;  %v461_v57 = vmul.f32 %v429_v49, %v429_v49  ;;  %v430_v58 = vsel %vm422_vm6, %v361_v44, 0.0 }
  0xef   : > { %399 = vst.msk [vmem:[%s739_s8] sm:$0xf] %vm398_vm3, %v609_v47  ;;  %v610_v59 = vpack.c.bf16 %v359_v52, %v359_v52  ;;  %v428_v60 = vsel %vm420_vm7, %v359_v52, 0.0  ;;  %v436_v61 = vsel %vm435_vm5, %v427_v48, 0.0  ;;  %403 = vst.msk [vmem:[%s739_s8 + $0x10] sm:$0xf] %vm398_vm3, %v613_v56  ;;  %v365_v2 = vmax.f32 %v347_v41, %v357_v53 }
  0xf0   : > { %402 = vst.msk [vmem:[%s739_s8 + $0xc] sm:$0xf] %vm398_vm3, %v612_v50  ;;  %v437_v62 = vsel %vm435_vm5, %v428_v60, 0.0  ;;  %v460_v63 = vmul.f32 %v428_v60, %v428_v60  ;;  %v431_v1 = vsel %vm423_vm9, %v362_v46, 0.0  ;;  %v363_v3 = vmax.f32 %v339_v42, %v355_v54 }
  0xf1   : > { %400 = vst.msk [vmem:[%s739_s8 + $0x4] sm:$0xf] %vm398_vm3, %v610_v59  ;;  %v438_v0 = vadd.f32 %v437_v62, %v436_v61  ;;  %v439_v4 = vsel %vm435_vm5, %v429_v49, 0.0  ;;  %v467_v5 = vsel %vm435_vm5, %v459_v55, 0.0  ;;  %v462_v6 = vmul.f32 %v430_v58, %v430_v58 }
  0xf2   : > { %v468_v7 = vsel %vm435_vm5, %v460_v63, 0.0  ;;  %v470_v8 = vsel %vm435_vm5, %v461_v57, 0.0  ;;  %v616_v12 = vpack.c.bf16 %v365_v2, %v365_v2  ;;  %v441_v13 = vsel %vm435_vm5, %v430_v58, 0.0 }
  0xf3   : > { %v440_v9 = vadd.f32 %v439_v4, %v438_v0  ;;  %v469_v10 = vadd.f32 %v468_v7, %v467_v5  ;;  %v463_v14 = vmul.f32 %v431_v1, %v431_v1  ;;  %v614_v15 = vpack.c.bf16 %v363_v3, %v363_v3 }
  0xf4   : > { %v432_v16 = vsel %vm424_vm11, %v363_v3, 0.0  ;;  %v433_v18 = vsel %vm425_vm8, %v364_v37, 0.0  ;;  %406 = vst.msk [vmem:[%s739_s8 + $0x1c] sm:$0xf] %vm398_vm3, %v616_v12  ;;  %v472_v20 = vsel %vm435_vm5, %v462_v6, 0.0  ;;  %v443_v21 = vsel %vm435_vm5, %v431_v1, 0.0 }
  0xf5   : > { %v471_v17 = vadd.f32 %v470_v8, %v469_v10  ;;  %v442_v19 = vadd.f32 %v441_v13, %v440_v9  ;;  %404 = vst.msk [vmem:[%s739_s8 + $0x14] sm:$0xf] %vm398_vm3, %v614_v15  ;;  %v464_v22 = vmul.f32 %v432_v16, %v432_v16  ;;  %v434_v26 = vsel %vm426_vm10, %v365_v2, 0.0 }
  0xf6   : > { %v465_v27 = vmul.f32 %v433_v18, %v433_v18  ;;  %v474_v23 = vsel %vm435_vm5, %v463_v14, 0.0  ;;  %v445_v28 = vsel %vm435_vm5, %v432_v16, 0.0  ;;  %v447_v31 = vsel %vm435_vm5, %v433_v18, 0.0 }
  0xf7   : > { %v444_v24 = vadd.f32 %v443_v21, %v442_v19  ;;  %v473_v25 = vadd.f32 %v472_v20, %v471_v17  ;;  %v466_v32 = vmul.f32 %v434_v26, %v434_v26  ;;  %v476_v33 = vsel %vm435_vm5, %v464_v22, 0.0 }
  0xf8   : > { %v478_v36 = vsel %vm435_vm5, %v465_v27, 0.0  ;;  %v449_v11 = vsel %vm435_vm5, %v434_v26, 0.0 }
  0xf9   : > { %v475_v29 = vadd.f32 %v474_v23, %v473_v25  ;;  %v446_v30 = vadd.f32 %v445_v28, %v444_v24  ;;  %v480_v39 = vsel %vm435_vm5, %v466_v32, 0.0 }
  0xfb   : > { %v448_v34 = vadd.f32 %v447_v31, %v446_v30  ;;  %v477_v35 = vadd.f32 %v476_v33, %v475_v29 }
  0xfd   : > { %v450_v37 = vadd.f32 %v449_v11, %v448_v34  ;;  %v479_v38 = vadd.f32 %v478_v36, %v477_v35 }
  0xff   : > { %v451_v40 = vrot.slane %v450_v37, 4  ;;  %v481_v41 = vadd.f32 %v480_v39, %v479_v38 }
 0x101   : > { %v452_v42 = vadd.f32 %v451_v40, %v450_v37  ;;  %v482_v43 = vrot.slane %v481_v41, 4 }
 0x103   : > { %v453_v44 = vrot.slane %v452_v42, 2  ;;  %v483_v45 = vadd.f32 %v482_v43, %v481_v41 }
 0x105   : > { %v454_v46 = vadd.f32 %v453_v44, %v452_v42  ;;  %v484_v47 = vrot.slane %v483_v45, 2 }
 0x107   : > { %v455_v48 = vrot.slane %v454_v46, 1  ;;  %v485_v49 = vadd.f32 %v484_v47, %v483_v45 }
 0x109   : > { %v456_v50 = vadd.f32 %v455_v48, %v454_v46  ;;  %v486_v51 = vrot.slane %v485_v49, 1 }
 0x10b   : > { %458 = vst.msk [vmem:[%s211_s12] sm:$0x1] %vm457_vm12, %v456_v50  ;;  %v487_v52 = vadd.f32 %v486_v51, %v485_v49 }
 0x10d   : > { %488 = vst.msk [vmem:[%s211_s12 + $0x1] sm:$0x1] %vm457_vm12, %v487_v52 }
 0x10e PF: > { %s15_s15 = sadd.s32 1, %s667_s15  }
 0x10f   : > { %p12_p5 = scmp.ge.s32.totalorder %s15_s15, 4  }
 0x111   :  { %14 = sbr.rel (!%p12_p5) target bundleno = 1 (0x1), region = 74 }

// kernel: _lambda_.3
= control target key start
LH: loop header
LB: loop body
LE: loop exit
PB: predicated region body
PF: predicated region fallthrough
CT: control target
= control target key end

     0   :  { %s418_s12 = smov 0   ;;  %s453_s0 = inlined_call_operand.vmem [shape: bf16[32,72], index: 0, kind: input, shape index: {}]   ;;  %s454_s1 = inlined_call_operand.vmem [shape: bf16[72,16], index: 1, kind: input, shape index: {}]   ;;  %s455_s2 = inlined_call_operand.vmem [shape: f32[1,16], index: 2, kind: input, shape index: {}]   ;;  %s456_s3 = inlined_call_operand.vmem [shape: f32[32,16], index: 3, kind: output, shape index: {}]  }
   0x1 LB: > { %s333_s13 = sadd.s32 4294967295, %s394_s12   ;;  %p337_p0 = scmp.ge.s32.totalorder %s394_s12, 1  ;;  %s394_s12 = sphi %s418_s12, %s13_s12  }
   0x2   : > { %p138_p1 = scmp.lt.s32.totalorder %s394_s12, 3 }
   0x4   : > { %p139_p2 = pnand %p337_p0, %p138_p1 }
   0x5   : > { %v382_v0 = vld [vmem:[%s454_s1] sm:$0xff] (!%p139_p2)   ;;  %v396_v1 = vmov (!%p139_p2), 0.0   ;;  %v383_v2 = vld [vmem:[%s454_s1 + $0x8] sm:$0xff] (!%p139_p2)   ;;  %vm397_vm0 = vmmov (!%p139_p2), 0   ;;  %s338_s18 = sshll.u32 (!%p139_p2), %s333_s13, 1  ;;  %v384_v3 = vld [vmem:[%s454_s1 + $0x10] sm:$0xff] (!%p139_p2)  }
   0x6   : > { %142 = sbr.rel (%p139_p2) target bundleno = 243 (0xf3), region = 32  ;;  %358 = vmatprep.subr.bf16.mxu0 (!%p139_p2), %v396_v1  ;;  %368 = vmatprep.mubr.msk.bf16.mxu0 (!%p139_p2), %vm397_vm0, %v396_v1  ;;  %p163_p3 = scmp.lt.s32.totalorder (!%p139_p2), %s338_s18, 3  ;;  %v385_v4 = vld [vmem:[%s454_s1 + $0x18] sm:$0xff] (!%p139_p2)   ;;  %v386_v5 = vld [vmem:[%s454_s1 + $0x20] ss:$0 sps:$4 sm:$0xff] (!%p139_p2)   ;;  %vm229_vm1 = vcmask (!%p139_p2), 1043456  }
   0x7   : > { %359 = vmatpush3.bf16.msra.mxu0 (!%p139_p2), %v382_v0  ;;  %v231_v6 = vsel (!%p139_p2), %vm229_vm1, %v386_v5, 0  ;;  %vm225_vm2 = vcmask (!%p139_p2), 588800   ;;  %v342_v8 = vld [vmem:[%s455_s2] ss:$0 sm:$0xff] (!%p139_p2)  ;;  %vm274_vm3 = vcmask (!%p139_p2), 130048  }
   0x8   : > { %360 = vmatprep.subr.bf16.mxu0 (!%p139_p2), %v396_v1 }
   0xb   : > { %361 = vmatpush3.bf16.msra.mxu0 (!%p139_p2), %v383_v2 }
   0xc   : > { %362 = vmatprep.subr.bf16.mxu0 (!%p139_p2), %v396_v1 }
   0xd   : > { %s458_s18 = smov (!%p163_p3, %s338_s18), 3 }
   0xe   : > { %s339_s21 = sshll.u32 %s458_s18, 2  ;;  %s341_s29 = sshll.u32 %s458_s18, 3 }
   0xf   : > { %s166_s24 = scalar_lea.vmem %s453_s0, %s339_s21  ;;  %363 = vmatpush3.bf16.msra.mxu0 %v384_v3  ;;  %s172_s7 = scalar_lea.vmem %s456_s3, %s341_s29 }
  0x10   : > { %364 = vmatprep.subr.bf16.mxu0 %v396_v1  ;;  %v387_v7 = vld [vmem:[%s166_s24] sm:$0xff]  }
  0x13   : > { %365 = vmatpush3.bf16.msra.mxu0 %v385_v4 }
  0x14   : > { %366 = vmatprep.subr.bf16.mxu0 %v396_v1 }
  0x17   : > { %367 = vmatpush3.bf16.msra.mxu0 %v231_v6 }
  0x1a   : > { %369 = vmatmul.mubr.msk.bf16.vlgmr.msra.gmra.mrb[0].mxu0 %vm225_vm2, %v387_v7 }
  0xed   : > { %v267_v9 = vpop.f32.mrb[0].mxu0 }
  0xee   : > { %v268_v10 = vadd.f32 %v342_v8, %v267_v9  ;;  %v370_v11 = vpop.f32.mrb[1].mxu0 }
  0xef   : > { %v270_v12 = vpop.f32.mrb[2].mxu0 }
  0xf0   : > { %275 = vst.msk [vmem:[%s172_s7] sm:$0xff] %vm274_vm3, %v268_v10  ;;  %v271_v13 = vadd.f32 %v342_v8, %v270_v12  ;;  %v371_v14 = vpop.f32.mrb[3].mxu0 }
  0xf2   : > { %276 = vst.msk [vmem:[%s172_s7 + $0x8] sm:$0xff] %vm274_vm3, %v271_v13 }
  0xf3 PF: > { %s13_s12 = sadd.s32 1, %s394_s12  }
  0xf4   : > { %p10_p4 = scmp.ge.s32.totalorder %s13_s12, 4  }
  0xf6   :  { %12 = sbr.rel (!%p10_p4) target bundleno = 1 (0x1), region = 62 }

</bundles_post_ra>
